<compile_context>
chip_gen: v6e
topology: v6e:2x2x1
jax: 0.10.0
libtpu: 0.0.40
codegen_flags: <defaults>
</compile_context>

<pallas_src>
import numpy as np
import jax
import jax.numpy as jnp
from jax.experimental import pallas as pl
from jax.experimental.pallas import tpu as pltpu

# ---- QattenMixer hyper-parameters (from __init__) --------------------------
N_AGENTS = 8
STATE_DIM = 48                 # int(np.prod(state_shape)); must be >= 4 * n_agents
U_DIM = 4                      # agent_own_state_size
Q1 = 64                        # n_query_embedding_layer1
Q2 = 32                        # n_query_embedding_layer2
K1 = 32                        # n_key_embedding_layer1
H1 = 64                        # n_head_embedding_layer1
H2 = 4                         # n_head_embedding_layer2
N_HEAD = 4                     # n_attention_head
C1 = 32                        # n_constrant_value
SCALE = float(np.sqrt(Q2))     # scaled_product_value

_W_ORDER = ("w1", "b1", "w2q", "b2q", "w2hc", "b2hc",
            "w3", "psel", "sumj", "gg", "qsel", "g4")


def _round_up(x, m):
    return ((x + m - 1) // m) * m


# ---- Pallas kernel ---------------------------------------------------------
def qatten_kernel(x_ref, qs_ref,
                  w1_ref, b1_ref, w2q_ref, b2q_ref, w2hc_ref, b2hc_ref,
                  w3_ref, psel_ref, sumj_ref, gg_ref, qsel_ref, g4_ref,
                  out_ref):
    f32 = jnp.float32
    x = x_ref[...]                                    # (tb, 48)
    qs = qs_ref[...]                                  # (tb, 8)

    # fused layer 1: [4x query hidden | head hidden | constraint hidden]
    z1 = jnp.dot(x, w1_ref[...], preferred_element_type=f32) + b1_ref[...]
    z1 = jnp.maximum(z1, 0.0)                         # (tb, 352)

    # fused layer 2: block-diagonal query heads + (head-weight, constraint) pair
    se = jnp.dot(z1[:, :N_HEAD * Q1], w2q_ref[...],
                 preferred_element_type=f32) + b2q_ref[...]            # (tb, 128)
    hc = jnp.dot(z1[:, N_HEAD * Q1:], w2hc_ref[...],
                 preferred_element_type=f32) + b2hc_ref[...]           # (tb, 5)
    w_h = jnp.abs(hc[:, 0:H2])                                         # (tb, 4)
    c = hc[:, H2:H2 + 1]                                               # (tb, 1)

    # key layer (wk, bk, 1/scale folded into w3):
    #   tvals[:, 32*j + 8*h + a] = t[b, h, j],  tvals[:, 128 + 8*h + a] = bias[b, h]
    tvals = jnp.dot(se, w3_ref[...], preferred_element_type=f32)       # (tb, 160)
    # own-agent features gathered from the states tile (no extra HBM stream):
    #   a_all[:, 32*j + 8*h + a] = states[b, 4*a + j]
    a_all = jnp.dot(x, psel_ref[...], preferred_element_type=f32)      # (tb, 128)

    # raw_lambda, head-batched: raw[:, 8*h + a]
    prod = a_all * tvals[:, :U_DIM * 32]                               # (tb, 128)
    raw = tvals[:, U_DIM * 32:] + jnp.dot(prod, sumj_ref[...],
                                          preferred_element_type=f32)  # (tb, 32)

    # per-head softmax over agents on a (tb, 32) lane slab
    gg = gg_ref[...]                                                   # (32, 32) per-head ones blocks
    mean_h = jnp.dot(raw, gg, preferred_element_type=f32) * (1.0 / N_AGENTS)
    p = jnp.exp(raw - mean_h)        # shift by per-head mean: softmax-invariant, denominator >= 1
    s = jnp.dot(p, gg, preferred_element_type=f32)                     # per-head sum, replicated
    r = pl.reciprocal(s, approx=True)
    r = r * (2.0 - s * r)            # one Newton step -> full f32 accuracy
    lam = p * r                                                        # (tb, 32)

    # q_tot = sum_h w_h[:, h] * sum_a lam[:, 8h+a] * qs[:, a]  +  c
    qs_rep = jnp.dot(qs, qsel_ref[...], preferred_element_type=f32)    # (tb, 32)
    qh = jnp.dot(lam * qs_rep, g4_ref[...], preferred_element_type=f32)  # (tb, 4)
    out_ref[...] = jnp.sum(qh * w_h, axis=-1, keepdims=True) + c


# ---- Parameter folding / fusion (done once, outside the kernel) ------------
def prepare_qatten_params(p):
    f = np.float32
    wq1 = np.asarray(p["wq1"], f); bq1 = np.asarray(p["bq1"], f)
    wq2 = np.asarray(p["wq2"], f); bq2 = np.asarray(p["bq2"], f)
    wk = np.asarray(p["wk"], f);   bk = np.asarray(p["bk"], f)
    wh1 = np.asarray(p["wh1"], f); bh1 = np.asarray(p["bh1"], f).reshape(-1)
    wh2 = np.asarray(p["wh2"], f); bh2 = np.asarray(p["bh2"], f).reshape(-1)
    wc1 = np.asarray(p["wc1"], f); bc1 = np.asarray(p["bc1"], f).reshape(-1)
    wc2 = np.asarray(p["wc2"], f); bc2 = np.asarray(p["bc2"], f).reshape(-1)

    # layer 1: (48, 352) = [wq1_0 | wq1_1 | wq1_2 | wq1_3 | wh1 | wc1]
    w1 = np.concatenate([wq1[h] for h in range(N_HEAD)] + [wh1, wc1], axis=1)
    b1 = np.concatenate([bq1[h] for h in range(N_HEAD)] + [bh1, bc1])[None, :]

    # layer 2 (query heads, block diagonal): (256, 128)
    w2q = np.zeros((N_HEAD * Q1, N_HEAD * Q2), f)
    for h in range(N_HEAD):
        w2q[h * Q1:(h + 1) * Q1, h * Q2:(h + 1) * Q2] = wq2[h]
    b2q = np.concatenate([bq2[h] for h in range(N_HEAD)])[None, :]

    # layer 2 (head weights + constraint value): (96, 5)
    w2hc = np.zeros((H1 + C1, H2 + 1), f)
    w2hc[:H1, :H2] = wh2
    w2hc[H1:, H2:] = wc2
    b2hc = np.concatenate([bh2, bc2])[None, :]

    # key layer folded with bk and 1/scale: (128, 160)
    ncol = N_HEAD * N_AGENTS                         # 32
    w3 = np.zeros((N_HEAD * Q2, (U_DIM + 1) * ncol), f)
    inv_s = 1.0 / SCALE
    for h in range(N_HEAD):
        r0, r1 = h * Q2, (h + 1) * Q2
        c0 = h * N_AGENTS
        for j in range(U_DIM):
            w3[r0:r1, j * ncol + c0:j * ncol + c0 + N_AGENTS] = wk[h, j, :][:, None] * inv_s
        w3[r0:r1, U_DIM * ncol + c0:U_DIM * ncol + c0 + N_AGENTS] = bk[h][:, None] * inv_s

    # own-feature gather: psel[4a + j, 32j + 8h + a] = 1
    psel = np.zeros((STATE_DIM, U_DIM * ncol), f)
    for j in range(U_DIM):
        for h in range(N_HEAD):
            for a in range(N_AGENTS):
                psel[U_DIM * a + j, j * ncol + h * N_AGENTS + a] = 1.0

    sumj = np.tile(np.eye(ncol, dtype=f), (U_DIM, 1))                   # (128, 32)
    gg = np.kron(np.eye(N_HEAD, dtype=f), np.ones((N_AGENTS, N_AGENTS), f))  # (32, 32)
    qsel = np.tile(np.eye(N_AGENTS, dtype=f), (1, N_HEAD))              # (8, 32)
    g4 = np.kron(np.eye(N_HEAD, dtype=f), np.ones((N_AGENTS, 1), f))    # (32, 4)

    prep = dict(w1=w1, b1=b1, w2q=w2q, b2q=b2q, w2hc=w2hc, b2hc=b2hc,
                w3=w3, psel=psel, sumj=sumj, gg=gg, qsel=qsel, g4=g4)
    return {k: jnp.asarray(v) for k, v in prep.items()}


# ---- Wrapper ---------------------------------------------------------------
def qatten_forward(agent_qs, states, prep, *, tb=1024):
    bs, T, n = agent_qs.shape
    assert n == N_AGENTS
    B = bs * T

    x = states.reshape(B, STATE_DIM).astype(jnp.float32)
    q = agent_qs.reshape(B, N_AGENTS).astype(jnp.float32)

    # row tile: multiple of 8 sublanes, capped at tb, padded batch
    tile = min(_round_up(tb, 8), _round_up(B, 8))
    b_pad = _round_up(B, tile)
    if b_pad != B:
        x = jnp.pad(x, ((0, b_pad - B), (0, 0)))
        q = jnp.pad(q, ((0, b_pad - B), (0, 0)))

    weights = [prep[k] for k in _W_ORDER]
    w_specs = [pl.BlockSpec(w.shape, lambda i: (0, 0)) for w in weights]

    flops_per_row = 2 * (STATE_DIM * 352 + 256 * 128 + 96 * 5 + 128 * 160 +
                         STATE_DIM * 128 + 128 * 32 + 2 * 32 * 32 + 8 * 32 + 32 * 4)
    cost = pl.CostEstimate(
        flops=flops_per_row * b_pad,
        transcendentals=2 * N_HEAD * N_AGENTS * b_pad,
        bytes_accessed=4 * (b_pad * (STATE_DIM + N_AGENTS + 1)
                            + sum(int(np.prod(w.shape)) for w in weights)),
    )

    out = pl.pallas_call(
        qatten_kernel,
        out_shape=jax.ShapeDtypeStruct((b_pad, 1), jnp.float32),
        grid=(b_pad // tile,),
        in_specs=[pl.BlockSpec((tile, STATE_DIM), lambda i: (i, 0)),
                  pl.BlockSpec((tile, N_AGENTS), lambda i: (i, 0))] + w_specs,
        out_specs=pl.BlockSpec((tile, 1), lambda i: (i, 0)),
        compiler_params=pltpu.CompilerParams(
            dimension_semantics=("parallel",)),
        cost_estimate=cost,
    )(x, q, *weights)

    return out[:B].reshape(bs, T, 1)


# ---- Pure-JAX reference (mirrors the PyTorch forward) ----------------------
def qatten_ref(agent_qs, states, p):
    bs, T, N = agent_qs.shape
    B = bs * T
    st = states.reshape(B, STATE_DIM).astype(jnp.float32)
    qs = agent_qs.reshape(B, 1, N).astype(jnp.float32)
    us = st[:, :U_DIM * N].reshape(B * N, U_DIM)

    lams = []
    for i in range(N_HEAD):
        se = jnp.maximum(st @ p['wq1'][i] + p['bq1'][i], 0.0) @ p['wq2'][i] + p['bq2'][i]
        ue = us @ p['wk'][i] + p['bk'][i]
        ue = ue.reshape(B, N, K1).transpose(0, 2, 1)
        raw = jnp.matmul(se.reshape(B, 1, Q2), ue) / SCALE
        lams.append(jax.nn.softmax(raw, axis=-1))
    lam = jnp.stack(lams, axis=1).squeeze(-2).transpose(0, 2, 1)        # (B, N, H)
    q_h = jnp.matmul(qs, lam)                                           # (B, 1, H)
    w_h = jnp.abs(jnp.maximum(st @ p['wh1'] + p['bh1'], 0.0) @ p['wh2'] + p['bh2'])
    sum_q_h = jnp.matmul(q_h, w_h.reshape(B, H2, 1)).reshape(B, 1)
    c = jnp.maximum(st @ p['wc1'] + p['bc1'], 0.0) @ p['wc2'] + p['bc2']
    return (sum_q_h + c).reshape(bs, T, 1)


# ---- Deterministic parameter init ------------------------------------------
def init_params(key):
    ks = jax.random.split(key, 14)
    n = lambda k, shape, s=0.1: (s * jax.random.normal(k, shape)).astype(jnp.float32)
    return {
        'wq1': n(ks[0], (N_HEAD, STATE_DIM, Q1)),
        'bq1': n(ks[1], (N_HEAD, Q1)),
        'wq2': n(ks[2], (N_HEAD, Q1, Q2)),
        'bq2': n(ks[3], (N_HEAD, Q2)),
        'wk':  n(ks[4], (N_HEAD, U_DIM, K1)),
        'bk':  n(ks[5], (N_HEAD, K1)),
        'wh1': n(ks[6], (STATE_DIM, H1)),
        'bh1': n(ks[7], (H1,)),
        'wh2': n(ks[8], (H1, H2)),
        'bh2': n(ks[9], (H2,)),
        'wc1': n(ks[10], (STATE_DIM, C1)),
        'bc1': n(ks[11], (C1,)),
        'wc2': n(ks[12], (C1, 1)),
        'bc2': n(ks[13], (1,)),
    }


if __name__ == "__main__":
    key = jax.random.PRNGKey(0)
    kp, ka, ks_ = jax.random.split(key, 3)

    params = init_params(kp)
    prep = prepare_qatten_params(params)        # done once (init-time folding)

    # small shape (single tile)
    bs, T = 2, 4
    agent_qs = jax.random.normal(ka, (bs, T, N_AGENTS), dtype=jnp.float32)
    states = jax.random.normal(ks_, (bs, T, STATE_DIM), dtype=jnp.float32)

    q_tot = jax.block_until_ready(qatten_forward(agent_qs, states, prep))
    q_ref = qatten_ref(agent_qs, states, params)
    assert q_tot.shape == (bs, T, 1)
    np.testing.assert_allclose(np.asarray(q_tot), np.asarray(q_ref),
                               rtol=1e-4, atol=1e-4)

    # multi-tile + padding path (B = 1500 -> two 1024-row grid steps)
    ka2, ks2 = jax.random.split(jax.random.PRNGKey(1))
    bs2, T2 = 6, 250
    aq2 = jax.random.normal(ka2, (bs2, T2, N_AGENTS), dtype=jnp.float32)
    st2 = jax.random.normal(ks2, (bs2, T2, STATE_DIM), dtype=jnp.float32)
    out2 = jax.block_until_ready(qatten_forward(aq2, st2, prep))
    ref2 = qatten_ref(aq2, st2, params)
    np.testing.assert_allclose(np.asarray(out2), np.asarray(ref2),
                               rtol=1e-4, atol=1e-4)

    print("KERNEL_OK")
</pallas_src>

<mosaic_0001>
module attributes {stable_mosaic.version = 11 : i64} {
  func.func @qatten_kernel(%arg0: i32, %arg1: memref<8x48xf32, #tpu.memory_space<vmem>>, %arg2: memref<8x8xf32, #tpu.memory_space<vmem>>, %arg3: memref<48x352xf32, #tpu.memory_space<vmem>>, %arg4: memref<1x352xf32, #tpu.memory_space<vmem>>, %arg5: memref<256x128xf32, #tpu.memory_space<vmem>>, %arg6: memref<1x128xf32, #tpu.memory_space<vmem>>, %arg7: memref<96x5xf32, #tpu.memory_space<vmem>>, %arg8: memref<1x5xf32, #tpu.memory_space<vmem>>, %arg9: memref<128x160xf32, #tpu.memory_space<vmem>>, %arg10: memref<48x128xf32, #tpu.memory_space<vmem>>, %arg11: memref<128x32xf32, #tpu.memory_space<vmem>>, %arg12: memref<32x32xf32, #tpu.memory_space<vmem>>, %arg13: memref<8x32xf32, #tpu.memory_space<vmem>>, %arg14: memref<32x4xf32, #tpu.memory_space<vmem>>, %arg15: memref<8x1xf32, #tpu.memory_space<vmem>>) attributes {dimension_semantics = [#tpu.dimension_semantics<parallel>], iteration_bounds = array<i64: 1>, scalar_prefetch = 0 : i64, scratch_operands = 0 : i64, tpu.core_type = #tpu.core_type<tc>, window_params = [{transform_indices = @transform_0, window_bounds = array<i64: 8, 48>}, {transform_indices = @transform_1, window_bounds = array<i64: 8, 8>}, {pipeline_mode = #tpu.pipeline_mode<synchronous>, transform_indices = @transform_2, window_bounds = array<i64: 48, 352>}, {pipeline_mode = #tpu.pipeline_mode<synchronous>, transform_indices = @transform_3, window_bounds = array<i64: 1, 352>}, {pipeline_mode = #tpu.pipeline_mode<synchronous>, transform_indices = @transform_4, window_bounds = array<i64: 256, 128>}, {pipeline_mode = #tpu.pipeline_mode<synchronous>, transform_indices = @transform_5, window_bounds = array<i64: 1, 128>}, {pipeline_mode = #tpu.pipeline_mode<synchronous>, transform_indices = @transform_6, window_bounds = array<i64: 96, 5>}, {pipeline_mode = #tpu.pipeline_mode<synchronous>, transform_indices = @transform_7, window_bounds = array<i64: 1, 5>}, {pipeline_mode = #tpu.pipeline_mode<synchronous>, transform_indices = @transform_8, window_bounds = array<i64: 128, 160>}, {pipeline_mode = #tpu.pipeline_mode<synchronous>, transform_indices = @transform_9, window_bounds = array<i64: 48, 128>}, {pipeline_mode = #tpu.pipeline_mode<synchronous>, transform_indices = @transform_10, window_bounds = array<i64: 128, 32>}, {pipeline_mode = #tpu.pipeline_mode<synchronous>, transform_indices = @transform_11, window_bounds = array<i64: 32, 32>}, {pipeline_mode = #tpu.pipeline_mode<synchronous>, transform_indices = @transform_12, window_bounds = array<i64: 8, 32>}, {pipeline_mode = #tpu.pipeline_mode<synchronous>, transform_indices = @transform_13, window_bounds = array<i64: 32, 4>}, {transform_indices = @transform_14, window_bounds = array<i64: 8, 1>}]} {
    %c0 = arith.constant 0 : index
    %c0_0 = arith.constant 0 : index
    %0 = vector.load %arg1[%c0, %c0_0] : memref<8x48xf32, #tpu.memory_space<vmem>>, vector<8x48xf32>
    %c0_1 = arith.constant 0 : index
    %c0_2 = arith.constant 0 : index
    %1 = vector.load %arg2[%c0_1, %c0_2] : memref<8x8xf32, #tpu.memory_space<vmem>>, vector<8x8xf32>
    %c0_3 = arith.constant 0 : index
    %c0_4 = arith.constant 0 : index
    %2 = vector.load %arg3[%c0_3, %c0_4] : memref<48x352xf32, #tpu.memory_space<vmem>>, vector<48x352xf32>
    %cst = arith.constant dense<0.000000e+00> : vector<8x352xf32>
    %3 = tpu.matmul %0, %2, %cst {dimension_numbers = #tpu.dot_dimension_numbers<[1], [0], [0], [1], [0, 0, 1, 1], [], []>} : vector<8x48xf32>, vector<48x352xf32>, vector<8x352xf32> -> vector<8x352xf32>
    %c0_5 = arith.constant 0 : index
    %c0_6 = arith.constant 0 : index
    %4 = vector.load %arg4[%c0_5, %c0_6] : memref<1x352xf32, #tpu.memory_space<vmem>>, vector<1x352xf32>
    %5 = vector.broadcast %4 : vector<1x352xf32> to vector<8x352xf32>
    %6 = arith.addf %3, %5 : vector<8x352xf32>
    %cst_7 = arith.constant 0.000000e+00 : f32
    %7 = vector.broadcast %cst_7 : f32 to vector<8x352xf32>
    %8 = arith.maximumf %6, %7 : vector<8x352xf32>
    %9 = vector.extract_strided_slice %8 {offsets = [0, 0], sizes = [8, 256], strides = [1, 1]} : vector<8x352xf32> to vector<8x256xf32>
    %c0_8 = arith.constant 0 : index
    %c0_9 = arith.constant 0 : index
    %10 = vector.load %arg5[%c0_8, %c0_9] : memref<256x128xf32, #tpu.memory_space<vmem>>, vector<256x128xf32>
    %cst_10 = arith.constant dense<0.000000e+00> : vector<8x128xf32>
    %11 = tpu.matmul %9, %10, %cst_10 {dimension_numbers = #tpu.dot_dimension_numbers<[1], [0], [0], [1], [0, 0, 1, 1], [], []>} : vector<8x256xf32>, vector<256x128xf32>, vector<8x128xf32> -> vector<8x128xf32>
    %c0_11 = arith.constant 0 : index
    %c0_12 = arith.constant 0 : index
    %12 = vector.load %arg6[%c0_11, %c0_12] : memref<1x128xf32, #tpu.memory_space<vmem>>, vector<1x128xf32>
    %13 = vector.broadcast %12 : vector<1x128xf32> to vector<8x128xf32>
    %14 = arith.addf %11, %13 : vector<8x128xf32>
    %15 = vector.extract_strided_slice %8 {offsets = [0, 256], sizes = [8, 96], strides = [1, 1]} : vector<8x352xf32> to vector<8x96xf32>
    %c0_13 = arith.constant 0 : index
    %c0_14 = arith.constant 0 : index
    %16 = vector.load %arg7[%c0_13, %c0_14] : memref<96x5xf32, #tpu.memory_space<vmem>>, vector<96x5xf32>
    %cst_15 = arith.constant dense<0.000000e+00> : vector<8x5xf32>
    %17 = tpu.matmul %15, %16, %cst_15 {dimension_numbers = #tpu.dot_dimension_numbers<[1], [0], [0], [1], [0, 0, 1, 1], [], []>} : vector<8x96xf32>, vector<96x5xf32>, vector<8x5xf32> -> vector<8x5xf32>
    %c0_16 = arith.constant 0 : index
    %c0_17 = arith.constant 0 : index
    %18 = vector.load %arg8[%c0_16, %c0_17] : memref<1x5xf32, #tpu.memory_space<vmem>>, vector<1x5xf32>
    %19 = vector.broadcast %18 : vector<1x5xf32> to vector<8x5xf32>
    %20 = arith.addf %17, %19 : vector<8x5xf32>
    %21 = vector.extract_strided_slice %20 {offsets = [0, 0], sizes = [8, 4], strides = [1, 1]} : vector<8x5xf32> to vector<8x4xf32>
    %22 = math.absf %21 : vector<8x4xf32>
    %23 = vector.extract_strided_slice %20 {offsets = [0, 4], sizes = [8, 1], strides = [1, 1]} : vector<8x5xf32> to vector<8x1xf32>
    %c0_18 = arith.constant 0 : index
    %c0_19 = arith.constant 0 : index
    %24 = vector.load %arg9[%c0_18, %c0_19] : memref<128x160xf32, #tpu.memory_space<vmem>>, vector<128x160xf32>
    %cst_20 = arith.constant dense<0.000000e+00> : vector<8x160xf32>
    %25 = tpu.matmul %14, %24, %cst_20 {dimension_numbers = #tpu.dot_dimension_numbers<[1], [0], [0], [1], [0, 0, 1, 1], [], []>} : vector<8x128xf32>, vector<128x160xf32>, vector<8x160xf32> -> vector<8x160xf32>
    %c0_21 = arith.constant 0 : index
    %c0_22 = arith.constant 0 : index
    %26 = vector.load %arg10[%c0_21, %c0_22] : memref<48x128xf32, #tpu.memory_space<vmem>>, vector<48x128xf32>
    %cst_23 = arith.constant dense<0.000000e+00> : vector<8x128xf32>
    %27 = tpu.matmul %0, %26, %cst_23 {dimension_numbers = #tpu.dot_dimension_numbers<[1], [0], [0], [1], [0, 0, 1, 1], [], []>} : vector<8x48xf32>, vector<48x128xf32>, vector<8x128xf32> -> vector<8x128xf32>
    %28 = vector.extract_strided_slice %25 {offsets = [0, 0], sizes = [8, 128], strides = [1, 1]} : vector<8x160xf32> to vector<8x128xf32>
    %29 = arith.mulf %27, %28 : vector<8x128xf32>
    %30 = vector.extract_strided_slice %25 {offsets = [0, 128], sizes = [8, 32], strides = [1, 1]} : vector<8x160xf32> to vector<8x32xf32>
    %c0_24 = arith.constant 0 : index
    %c0_25 = arith.constant 0 : index
    %31 = vector.load %arg11[%c0_24, %c0_25] : memref<128x32xf32, #tpu.memory_space<vmem>>, vector<128x32xf32>
    %cst_26 = arith.constant dense<0.000000e+00> : vector<8x32xf32>
    %32 = tpu.matmul %29, %31, %cst_26 {dimension_numbers = #tpu.dot_dimension_numbers<[1], [0], [0], [1], [0, 0, 1, 1], [], []>} : vector<8x128xf32>, vector<128x32xf32>, vector<8x32xf32> -> vector<8x32xf32>
    %33 = arith.addf %30, %32 : vector<8x32xf32>
    %c0_27 = arith.constant 0 : index
    %c0_28 = arith.constant 0 : index
    %34 = vector.load %arg12[%c0_27, %c0_28] : memref<32x32xf32, #tpu.memory_space<vmem>>, vector<32x32xf32>
    %cst_29 = arith.constant dense<0.000000e+00> : vector<8x32xf32>
    %35 = tpu.matmul %33, %34, %cst_29 {dimension_numbers = #tpu.dot_dimension_numbers<[1], [0], [0], [1], [0, 0, 1, 1], [], []>} : vector<8x32xf32>, vector<32x32xf32>, vector<8x32xf32> -> vector<8x32xf32>
    %cst_30 = arith.constant 1.250000e-01 : f32
    %36 = vector.broadcast %cst_30 : f32 to vector<8x32xf32>
    %37 = arith.mulf %35, %36 : vector<8x32xf32>
    %38 = arith.subf %33, %37 : vector<8x32xf32>
    %39 = math.exp %38 : vector<8x32xf32>
    %cst_31 = arith.constant dense<0.000000e+00> : vector<8x32xf32>
    %40 = tpu.matmul %39, %34, %cst_31 {dimension_numbers = #tpu.dot_dimension_numbers<[1], [0], [0], [1], [0, 0, 1, 1], [], []>} : vector<8x32xf32>, vector<32x32xf32>, vector<8x32xf32> -> vector<8x32xf32>
    %41 = tpu.reciprocal %40 {approx = true} : vector<8x32xf32> -> vector<8x32xf32>
    %42 = arith.mulf %40, %41 : vector<8x32xf32>
    %cst_32 = arith.constant 2.000000e+00 : f32
    %43 = vector.broadcast %cst_32 : f32 to vector<8x32xf32>
    %44 = arith.subf %43, %42 : vector<8x32xf32>
    %45 = arith.mulf %41, %44 : vector<8x32xf32>
    %46 = arith.mulf %39, %45 : vector<8x32xf32>
    %c0_33 = arith.constant 0 : index
    %c0_34 = arith.constant 0 : index
    %47 = vector.load %arg13[%c0_33, %c0_34] : memref<8x32xf32, #tpu.memory_space<vmem>>, vector<8x32xf32>
    %cst_35 = arith.constant dense<0.000000e+00> : vector<8x32xf32>
    %48 = tpu.matmul %1, %47, %cst_35 {dimension_numbers = #tpu.dot_dimension_numbers<[1], [0], [0], [1], [0, 0, 1, 1], [], []>} : vector<8x8xf32>, vector<8x32xf32>, vector<8x32xf32> -> vector<8x32xf32>
    %49 = arith.mulf %46, %48 : vector<8x32xf32>
    %c0_36 = arith.constant 0 : index
    %c0_37 = arith.constant 0 : index
    %50 = vector.load %arg14[%c0_36, %c0_37] : memref<32x4xf32, #tpu.memory_space<vmem>>, vector<32x4xf32>
    %cst_38 = arith.constant dense<0.000000e+00> : vector<8x4xf32>
    %51 = tpu.matmul %49, %50, %cst_38 {dimension_numbers = #tpu.dot_dimension_numbers<[1], [0], [0], [1], [0, 0, 1, 1], [], []>} : vector<8x32xf32>, vector<32x4xf32>, vector<8x4xf32> -> vector<8x4xf32>
    %52 = arith.mulf %51, %22 : vector<8x4xf32>
    %cst_39 = arith.constant dense<0.000000e+00> : vector<8xf32>
    %53 = vector.multi_reduction <add>, %52, %cst_39 [1] : vector<8x4xf32> to vector<8xf32>
    %54 = vector.shape_cast %53 : vector<8xf32> to vector<8x1xf32>
    %55 = arith.addf %54, %23 : vector<8x1xf32>
    %c0_40 = arith.constant 0 : index
    %c0_41 = arith.constant 0 : index
    %56 = vector.load %arg15[%c0_40, %c0_41] : memref<8x1xf32, #tpu.memory_space<vmem>>, vector<8x1xf32>
    tpu.vector_store %arg15[%c0_40, %c0_41], %55 {strides = array<i32>} : memref<8x1xf32, #tpu.memory_space<vmem>>, vector<8x1xf32>,
    return
  }
  func.func @transform_0(%arg0: i32) -> (i32, i32) {
    %c0_i32 = arith.constant 0 : i32
    %c0_i32_0 = arith.constant 0 : i32
    return %arg0, %c0_i32 : i32, i32
  }
  func.func @transform_1(%arg0: i32) -> (i32, i32) {
    %c0_i32 = arith.constant 0 : i32
    %c0_i32_0 = arith.constant 0 : i32
    return %arg0, %c0_i32 : i32, i32
  }
  func.func @transform_2(%arg0: i32) -> (i32, i32) {
    %c0_i32 = arith.constant 0 : i32
    %c0_i32_0 = arith.constant 0 : i32
    %c0_i32_1 = arith.constant 0 : i32
    return %c0_i32, %c0_i32_0 : i32, i32
  }
  func.func @transform_3(%arg0: i32) -> (i32, i32) {
    %c0_i32 = arith.constant 0 : i32
    %c0_i32_0 = arith.constant 0 : i32
    %c0_i32_1 = arith.constant 0 : i32
    return %c0_i32, %c0_i32_0 : i32, i32
  }
  func.func @transform_4(%arg0: i32) -> (i32, i32) {
    %c0_i32 = arith.constant 0 : i32
    %c0_i32_0 = arith.constant 0 : i32
    %c0_i32_1 = arith.constant 0 : i32
    return %c0_i32, %c0_i32_0 : i32, i32
  }
  func.func @transform_5(%arg0: i32) -> (i32, i32) {
    %c0_i32 = arith.constant 0 : i32
    %c0_i32_0 = arith.constant 0 : i32
    %c0_i32_1 = arith.constant 0 : i32
    return %c0_i32, %c0_i32_0 : i32, i32
  }
  func.func @transform_6(%arg0: i32) -> (i32, i32) {
    %c0_i32 = arith.constant 0 : i32
    %c0_i32_0 = arith.constant 0 : i32
    %c0_i32_1 = arith.constant 0 : i32
    return %c0_i32, %c0_i32_0 : i32, i32
  }
  func.func @transform_7(%arg0: i32) -> (i32, i32) {
    %c0_i32 = arith.constant 0 : i32
    %c0_i32_0 = arith.constant 0 : i32
    %c0_i32_1 = arith.constant 0 : i32
    return %c0_i32, %c0_i32_0 : i32, i32
  }
  func.func @transform_8(%arg0: i32) -> (i32, i32) {
    %c0_i32 = arith.constant 0 : i32
    %c0_i32_0 = arith.constant 0 : i32
    %c0_i32_1 = arith.constant 0 : i32
    return %c0_i32, %c0_i32_0 : i32, i32
  }
  func.func @transform_9(%arg0: i32) -> (i32, i32) {
    %c0_i32 = arith.constant 0 : i32
    %c0_i32_0 = arith.constant 0 : i32
    %c0_i32_1 = arith.constant 0 : i32
    return %c0_i32, %c0_i32_0 : i32, i32
  }
  func.func @transform_10(%arg0: i32) -> (i32, i32) {
    %c0_i32 = arith.constant 0 : i32
    %c0_i32_0 = arith.constant 0 : i32
    %c0_i32_1 = arith.constant 0 : i32
    return %c0_i32, %c0_i32_0 : i32, i32
  }
  func.func @transform_11(%arg0: i32) -> (i32, i32) {
    %c0_i32 = arith.constant 0 : i32
    %c0_i32_0 = arith.constant 0 : i32
    %c0_i32_1 = arith.constant 0 : i32
    return %c0_i32, %c0_i32_0 : i32, i32
  }
  func.func @transform_12(%arg0: i32) -> (i32, i32) {
    %c0_i32 = arith.constant 0 : i32
    %c0_i32_0 = arith.constant 0 : i32
    %c0_i32_1 = arith.constant 0 : i32
    return %c0_i32, %c0_i32_0 : i32, i32
  }
  func.func @transform_13(%arg0: i32) -> (i32, i32) {
    %c0_i32 = arith.constant 0 : i32
    %c0_i32_0 = arith.constant 0 : i32
    %c0_i32_1 = arith.constant 0 : i32
    return %c0_i32, %c0_i32_0 : i32, i32
  }
  func.func @transform_14(%arg0: i32) -> (i32, i32) {
    %c0_i32 = arith.constant 0 : i32
    %c0_i32_0 = arith.constant 0 : i32
    return %arg0, %c0_i32 : i32, i32
  }
}

</mosaic_0001>

<bundles_post_ra>
// kernel: tpu_custom_call.1
= control target key start
LH: loop header
LB: loop body
LE: loop exit
PB: predicated region body
PF: predicated region fallthrough
CT: control target
= control target key end

     0   :  { %v1274_v3 = vmov 0.0   ;;  %vm1275_vm0 = vmmov 0   ;;  %vm84_vm1 = vcmask 392192   ;;  %vm360_vm2 = vcmask 785408   ;;  %s1830_s2 = inlined_call_operand.vmem [shape: f32[48,352], index: 2, kind: input, shape index: {}]   ;;  %s1831_s0 = inlined_call_operand.vmem [shape: f32[8,48], index: 0, kind: input, shape index: {}]   ;;  %s1832_s4 = inlined_call_operand.vmem [shape: f32[256,128], index: 4, kind: input, shape index: {}]   ;;  %s1833_s6 = inlined_call_operand.vmem [shape: f32[96,5], index: 6, kind: input, shape index: {}]   ;;  %s1834_s8 = inlined_call_operand.vmem [shape: f32[128,160], index: 8, kind: input, shape index: {}]   ;;  %s1835_s3 = inlined_call_operand.vmem [shape: f32[1,352], index: 3, kind: input, shape index: {}]   ;;  %s1836_s9 = inlined_call_operand.vmem [shape: f32[48,128], index: 9, kind: input, shape index: {}]   ;;  %s1837_s10 = inlined_call_operand.vmem [shape: f32[128,32], index: 10, kind: input, shape index: {}]   ;;  %s1838_s5 = inlined_call_operand.vmem [shape: f32[1,128], index: 5, kind: input, shape index: {}]   ;;  %s1839_s11 = inlined_call_operand.vmem [shape: f32[32,32], index: 11, kind: input, shape index: {}]   ;;  %s1840_s12 = inlined_call_operand.vmem [shape: f32[8,32], index: 12, kind: input, shape index: {}]   ;;  %s1841_s1 = inlined_call_operand.vmem [shape: f32[8,8], index: 1, kind: input, shape index: {}]   ;;  %s1842_s13 = inlined_call_operand.vmem [shape: f32[32,4], index: 13, kind: input, shape index: {}]   ;;  %s1843_s7 = inlined_call_operand.vmem [shape: f32[1,5], index: 7, kind: input, shape index: {}]   ;;  %s1844_s14 = inlined_call_operand.vmem [shape: f32[8,1], index: 14, kind: output, shape index: {}]  }
   0x1   :  { %v65_v0 = vld [vmem:[%s1830_s2 + $0x80] sm:$0xff]  ;;  %v64_v1 = vld [vmem:[%s1830_s2 + $0x78] sm:$0xff]  ;;  %v62_v2 = vld [vmem:[%s1830_s2 + $0x68] sm:$0xff]  ;;  %152 = vmatprep.mubr.f32.mxu0 %v1274_v3  ;;  %1137 = vmatprep.subr.mxu1 %v1274_v3  ;;  %vm706_vm3 = vcmask 261120   ;;  %vm863_vm4 = vcmask 64512   ;;  %vm1016_vm5 = vcmask 31744  }
   0x2   :  { %108 = vmatprep.subr.mxu0 %v65_v0  ;;  %v61_v4 = vld [vmem:[%s1830_s2 + $0x60] sm:$0xff]  ;;  %1149 = vmatprep.mubr.msk.f32.mxu1 %vm1275_vm0, %v1274_v3  ;;  %v59_v5 = vld [vmem:[%s1830_s2 + $0x50] sm:$0xff]  ;;  %v58_v6 = vld [vmem:[%s1830_s2 + $0x48] sm:$0xff]  ;;  %vm1025_vm6 = vcmask 7168  }
   0x3   :  { %109 = vmatpush1.msra.mxu0 %v64_v1  ;;  %v56_v7 = vld [vmem:[%s1830_s2 + $0x38] sm:$0xff]  ;;  %v66_v8 = vld [vmem:[%s1830_s2 + $0x88] sm:$0xff]  ;;  %v63_v9 = vld [vmem:[%s1830_s2 + $0x70] sm:$0xff]  ;;  %v69_v1 = vlaneseq }
   0x4   :  { %110 = vmatprep.subr.mxu0 %v62_v2  ;;  %v55_v10 = vld [vmem:[%s1830_s2 + $0x30] sm:$0xff]  ;;  %1138 = vmatpush3.msra.mxu1 %v66_v8  ;;  %v53_v11 = vld [vmem:[%s1830_s2 + $0x20] sm:$0xff]  ;;  %v60_v12 = vld [vmem:[%s1830_s2 + $0x58] sm:$0xff] }
   0x5   :  { %111 = vmatpush1.msra.mxu0 %v61_v4  ;;  %1139 = vmatprep.subr.mxu1 %v1274_v3  ;;  %v52_v13 = vld [vmem:[%s1830_s2 + $0x18] sm:$0xff]  ;;  %v50_v14 = vld [vmem:[%s1830_s2 + $0x8] sm:$0xff]  ;;  %v57_v15 = vld [vmem:[%s1830_s2 + $0x40] sm:$0xff]  ;;  %v70_v2 = vshrl.u32 %v69_v1, 7 }
   0x6   :  { %112 = vmatprep.subr.mxu0 %v59_v5  ;;  %1140 = vmatpush3.msra.mxu1 %v63_v9  ;;  %v49_v16 = vld [vmem:[%s1830_s2] sm:$0xff]  ;;  %v54_v18 = vld [vmem:[%s1830_s2 + $0x28] sm:$0xff]  ;;  %v263_v19 = vld [vmem:[%s1832_s4 + $0xf8] sm:$0xff] }
   0x7   :  { %113 = vmatpush1.msra.mxu0 %v58_v6  ;;  %1141 = vmatprep.subr.mxu1 %v1274_v3  ;;  %v1409_v17 = vld [vmem:[%s1831_s0] sm:$0xff]  ;;  %v51_v20 = vld [vmem:[%s1830_s2 + $0x10] sm:$0xff]  ;;  %v247_v21 = vld [vmem:[%s1832_s4 + $0x78] sm:$0xff]  ;;  %v71_v4 = vsub.s32 0, %v70_v2  ;;  %v75_v6 = vsub.s32 1, %v70_v2 }
   0x8   :  { %114 = vmatprep.subr.mxu0 %v56_v7  ;;  %1142 = vmatpush3.msra.mxu1 %v60_v12  ;;  %v262_v22 = vld [vmem:[%s1832_s4 + $0xf0] sm:$0xff]  ;;  %v261_v24 = vld [vmem:[%s1832_s4 + $0xe8] sm:$0xff]  ;;  %v260_v26 = vld [vmem:[%s1832_s4 + $0xe0] sm:$0xff]  ;;  %v79_v7 = vsub.s32 2, %v70_v2 }
   0x9   :  { %115 = vmatpush1.msra.mxu0 %v55_v10  ;;  %1143 = vmatprep.subr.mxu1 %v1274_v3  ;;  %v246_v23 = vld [vmem:[%s1832_s4 + $0x70] sm:$0xff]  ;;  %v245_v25 = vld [vmem:[%s1832_s4 + $0x68] sm:$0xff]  ;;  %v244_v27 = vld [vmem:[%s1832_s4 + $0x60] sm:$0xff] }
   0xa   :  { %116 = vmatprep.subr.mxu0 %v53_v11  ;;  %1144 = vmatpush3.msra.mxu1 %v57_v15  ;;  %v259_v28 = vld [vmem:[%s1832_s4 + $0xd8] sm:$0xff]  ;;  %v258_v30 = vld [vmem:[%s1832_s4 + $0xd0] sm:$0xff]  ;;  %v257_v32 = vld [vmem:[%s1832_s4 + $0xc8] sm:$0xff] }
   0xb   :  { %117 = vmatpush1.msra.mxu0 %v52_v13  ;;  %1145 = vmatprep.subr.mxu1 %v1274_v3  ;;  %v243_v29 = vld [vmem:[%s1832_s4 + $0x58] sm:$0xff]  ;;  %v242_v31 = vld [vmem:[%s1832_s4 + $0x50] sm:$0xff]  ;;  %v241_v33 = vld [vmem:[%s1832_s4 + $0x48] sm:$0xff] }
   0xc   :  { %118 = vmatprep.subr.mxu0 %v50_v14  ;;  %1146 = vmatpush3.msra.mxu1 %v54_v18  ;;  %v256_v34 = vld [vmem:[%s1832_s4 + $0xc0] sm:$0xff]  ;;  %v255_v36 = vld [vmem:[%s1832_s4 + $0xb8] sm:$0xff]  ;;  %v254_v38 = vld [vmem:[%s1832_s4 + $0xb0] sm:$0xff] }
   0xd   :  { %119 = vmatpush1.msra.mxu0 %v49_v16  ;;  %1147 = vmatprep.subr.mxu1 %v1274_v3  ;;  %v240_v35 = vld [vmem:[%s1832_s4 + $0x40] sm:$0xff]  ;;  %v239_v37 = vld [vmem:[%s1832_s4 + $0x38] sm:$0xff]  ;;  %v238_v39 = vld [vmem:[%s1832_s4 + $0x30] sm:$0xff] }
   0xe   :  { %1031 = vmatmul.mubr.msk.f32.vlgmr.msra.gmra.mxu0 %vm84_vm1, %v1409_v17  ;;  %1048 = vmatprep.subr.mxu0 %v263_v19  ;;  %v253_v40 = vld [vmem:[%s1832_s4 + $0xa8] sm:$0xff]  ;;  %v252_v42 = vld [vmem:[%s1832_s4 + $0xa0] sm:$0xff]  ;;  %v251_v44 = vld [vmem:[%s1832_s4 + $0x98] sm:$0xff] }
   0xf   :  { %1148 = vmatpush3.msra.mxu1 %v51_v20  ;;  %1049 = vmatpush3.msra.mxu0 %v247_v21  ;;  %v237_v41 = vld [vmem:[%s1832_s4 + $0x28] sm:$0xff]  ;;  %v236_v43 = vld [vmem:[%s1832_s4 + $0x20] sm:$0xff]  ;;  %v235_v45 = vld [vmem:[%s1832_s4 + $0x18] sm:$0xff] }
  0x10   :  { %1150 = vmatmul.mubr.msk.f32.vlgmr.msra.gmra.mxu1 %vm84_vm1, %v1409_v17  ;;  %1050 = vmatprep.subr.mxu0 %v262_v22  ;;  %v250_v46 = vld [vmem:[%s1832_s4 + $0x90] sm:$0xff]  ;;  %v249_v48 = vld [vmem:[%s1832_s4 + $0x88] sm:$0xff]  ;;  %v248_v50 = vld [vmem:[%s1832_s4 + $0x80] sm:$0xff] }
  0x11   :  { %1051 = vmatpush3.msra.mxu0 %v246_v23  ;;  %1152 = vmatprep.subr.mxu1 %v1274_v3  ;;  %v234_v47 = vld [vmem:[%s1832_s4 + $0x10] sm:$0xff]  ;;  %v233_v49 = vld [vmem:[%s1832_s4 + $0x8] sm:$0xff]  ;;  %v232_v51 = vld [vmem:[%s1832_s4] sm:$0xff] }
  0x12   :  { %1052 = vmatprep.subr.mxu0 %v261_v24  ;;  %1176 = vmatprep.mubr.msk.f32.mxu1 %vm1275_vm0, %v1274_v3  ;;  %v352_v52 = vld [vmem:[%s1833_s6 + $0x58] sm:$0xff]  ;;  %v351_v53 = vld [vmem:[%s1833_s6 + $0x50] sm:$0xff]  ;;  %v350_v54 = vld [vmem:[%s1833_s6 + $0x48] sm:$0xff] }
  0x13   :  { %1053 = vmatpush3.msra.mxu0 %v245_v25  ;;  %1153 = vmatpush3.msra.mxu1 %v352_v52  ;;  %v349_v55 = vld [vmem:[%s1833_s6 + $0x40] sm:$0xff]  ;;  %v348_v56 = vld [vmem:[%s1833_s6 + $0x38] sm:$0xff]  ;;  %v347_v57 = vld [vmem:[%s1833_s6 + $0x30] sm:$0xff] }
  0x14   :  { %1054 = vmatprep.subr.mxu0 %v260_v26  ;;  %1154 = vmatprep.subr.mxu1 %v1274_v3  ;;  %v346_v58 = vld [vmem:[%s1833_s6 + $0x28] sm:$0xff]  ;;  %v345_v59 = vld [vmem:[%s1833_s6 + $0x20] sm:$0xff]  ;;  %v344_v60 = vld [vmem:[%s1833_s6 + $0x18] sm:$0xff] }
  0x15   :  { %1055 = vmatpush3.msra.mxu0 %v244_v27  ;;  %1155 = vmatpush3.msra.mxu1 %v351_v53  ;;  %v343_v61 = vld [vmem:[%s1833_s6 + $0x10] sm:$0xff]  ;;  %v342_v62 = vld [vmem:[%s1833_s6 + $0x8] sm:$0xff]  ;;  %v341_v63 = vld [vmem:[%s1833_s6] sm:$0xff] }
  0x16   :  { %1056 = vmatprep.subr.mxu0 %v259_v28  ;;  %1156 = vmatprep.subr.mxu1 %v1274_v3  ;;  %v466_v0 = vld [vmem:[%s1834_s8 + $0xf8] sm:$0xff]  ;;  %v67_v5 = vld [vmem:[%s1835_s3] sm:$0x7]  ;;  %v465_v22 = vld [vmem:[%s1834_s8 + $0xf0] sm:$0xff] }
  0x17   :  { %1057 = vmatpush3.msra.mxu0 %v243_v29  ;;  %1157 = vmatpush3.msra.mxu1 %v350_v54  ;;  %v72_v8 = vrot.slane %v67_v5, %v71_v4  ;;  %v76_v9 = vrot.slane %v67_v5, %v75_v6  ;;  %v80_v11 = vrot.slane %v67_v5, %v79_v7  ;;  %v543_v23 = vld [vmem:[%s1836_s9 + $0x28] sm:$0xff]  ;;  %v463_v25 = vld [vmem:[%s1834_s8 + $0xe0] sm:$0xff]  ;;  %v462_v27 = vld [vmem:[%s1834_s8 + $0xd8] sm:$0xff] }
  0x18   :  { %1058 = vmatprep.subr.mxu0 %v258_v30  ;;  %1158 = vmatprep.subr.mxu1 %v1274_v3  ;;  %v464_v24 = vld [vmem:[%s1834_s8 + $0xe8] sm:$0xff]  ;;  %v542_v26 = vld [vmem:[%s1836_s9 + $0x20] sm:$0xff]  ;;  %v461_v28 = vld [vmem:[%s1834_s8 + $0xd0] sm:$0xff] }
  0x19   :  { %1059 = vmatpush3.msra.mxu0 %v242_v31  ;;  %1159 = vmatpush3.msra.mxu1 %v349_v55  ;;  %v541_v29 = vld [vmem:[%s1836_s9 + $0x18] sm:$0xff]  ;;  %v460_v30 = vld [vmem:[%s1834_s8 + $0xc8] sm:$0xff]  ;;  %v459_v31 = vld [vmem:[%s1834_s8 + $0xc0] sm:$0xff] }
  0x1a   :  { %1060 = vmatprep.subr.mxu0 %v257_v32  ;;  %1160 = vmatprep.subr.mxu1 %v1274_v3  ;;  %v458_v32 = vld [vmem:[%s1834_s8 + $0xb8] sm:$0xff]  ;;  %v439_v52 = vld [vmem:[%s1834_s8 + $0x20] sm:$0xff]  ;;  %v539_v53 = vld [vmem:[%s1836_s9 + $0x8] sm:$0xff] }
  0x1b   :  { %1061 = vmatpush3.msra.mxu0 %v241_v33  ;;  %1161 = vmatpush3.msra.mxu1 %v348_v56  ;;  %v457_v33 = vld [vmem:[%s1834_s8 + $0xb0] sm:$0xff]  ;;  %v438_v54 = vld [vmem:[%s1834_s8 + $0x18] sm:$0xff]  ;;  %v538_v56 = vld [vmem:[%s1836_s9] sm:$0xff] }
  0x1c   :  { %1062 = vmatprep.subr.mxu0 %v256_v34  ;;  %1162 = vmatprep.subr.mxu1 %v1274_v3  ;;  %v456_v34 = vld [vmem:[%s1834_s8 + $0xa8] sm:$0xff]  ;;  %v437_v55 = vld [vmem:[%s1834_s8 + $0x10] sm:$0xff]  ;;  %v623_v1 = vld [vmem:[%s1837_s10 + $0x40] sm:$0xff] }
  0x1d   :  { %1063 = vmatpush3.msra.mxu0 %v240_v35  ;;  %1163 = vmatpush3.msra.mxu1 %v347_v57  ;;  %v455_v35 = vld [vmem:[%s1834_s8 + $0xa0] sm:$0xff]  ;;  %v436_v57 = vld [vmem:[%s1834_s8 + $0x8] sm:$0xff]  ;;  %v622_v2 = vld [vmem:[%s1837_s10 + $0x38] sm:$0xff] }
  0x1e   :  { %1064 = vmatprep.subr.mxu0 %v255_v36  ;;  %1164 = vmatprep.subr.mxu1 %v1274_v3  ;;  %v454_v36 = vld [vmem:[%s1834_s8 + $0x98] sm:$0xff]  ;;  %v621_v4 = vld [vmem:[%s1837_s10 + $0x30] sm:$0xff]  ;;  %v620_v5 = vld [vmem:[%s1837_s10 + $0x28] sm:$0xff] }
  0x1f   :  { %1065 = vmatpush3.msra.mxu0 %v239_v37  ;;  %1165 = vmatpush3.msra.mxu1 %v346_v58  ;;  %v453_v37 = vld [vmem:[%s1834_s8 + $0x90] sm:$0xff]  ;;  %v435_v58 = vld [vmem:[%s1834_s8] sm:$0xff]  ;;  %v618_v7 = vld [vmem:[%s1837_s10 + $0x18] sm:$0xff] }
  0x20   :  { %1066 = vmatprep.subr.mxu0 %v254_v38  ;;  %1166 = vmatprep.subr.mxu1 %v1274_v3  ;;  %v452_v38 = vld [vmem:[%s1834_s8 + $0x88] sm:$0xff]  ;;  %v619_v6 = vld [vmem:[%s1837_s10 + $0x20] sm:$0xff] }
  0x21   :  { %1067 = vmatpush3.msra.mxu0 %v238_v39  ;;  %1167 = vmatpush3.msra.mxu1 %v345_v59  ;;  %v451_v39 = vld [vmem:[%s1834_s8 + $0x80] sm:$0xff]  ;;  %v630_v59 = vld [vmem:[%s1837_s10 + $0x78] sm:$0xff] }
  0x22   :  { %1068 = vmatprep.subr.mxu0 %v253_v40  ;;  %1168 = vmatprep.subr.mxu1 %v1274_v3  ;;  %v450_v40 = vld [vmem:[%s1834_s8 + $0x78] sm:$0xff] }
  0x23   :  { %1069 = vmatpush3.msra.mxu0 %v237_v41  ;;  %1169 = vmatpush3.msra.mxu1 %v344_v60  ;;  %v449_v41 = vld [vmem:[%s1834_s8 + $0x70] sm:$0xff]  ;;  %v628_v60 = vld [vmem:[%s1837_s10 + $0x68] sm:$0xff] }
  0x24   :  { %1070 = vmatprep.subr.mxu0 %v252_v42  ;;  %1170 = vmatprep.subr.mxu1 %v1274_v3  ;;  %v448_v42 = vld [vmem:[%s1834_s8 + $0x68] sm:$0xff] }
  0x25   :  { %1071 = vmatpush3.msra.mxu0 %v236_v43  ;;  %1171 = vmatpush3.msra.mxu1 %v343_v61  ;;  %v447_v43 = vld [vmem:[%s1834_s8 + $0x60] sm:$0xff] }
  0x26   :  { %1072 = vmatprep.subr.mxu0 %v251_v44  ;;  %1172 = vmatprep.subr.mxu1 %v1274_v3  ;;  %v446_v44 = vld [vmem:[%s1834_s8 + $0x58] sm:$0xff]  ;;  %v627_v61 = vld [vmem:[%s1837_s10 + $0x60] sm:$0xff] }
  0x27   :  { %1073 = vmatpush3.msra.mxu0 %v235_v45  ;;  %1173 = vmatpush3.msra.mxu1 %v342_v62  ;;  %v445_v45 = vld [vmem:[%s1834_s8 + $0x50] sm:$0xff]  ;;  %v626_v62 = vld [vmem:[%s1837_s10 + $0x58] sm:$0xff] }
  0x28   :  { %1074 = vmatprep.subr.mxu0 %v250_v46  ;;  %1174 = vmatprep.subr.mxu1 %v1274_v3  ;;  %v444_v46 = vld [vmem:[%s1834_s8 + $0x48] sm:$0xff] }
  0x29   :  { %1075 = vmatpush3.msra.mxu0 %v234_v47  ;;  %1175 = vmatpush3.msra.mxu1 %v341_v63  ;;  %v443_v47 = vld [vmem:[%s1834_s8 + $0x40] sm:$0xff]  ;;  %v625_v63 = vld [vmem:[%s1837_s10 + $0x50] sm:$0xff] }
  0x2a   :  { %1076 = vmatprep.subr.mxu0 %v249_v48  ;;  %467 = vmatprep.subr.mxu1 %v466_v0  ;;  %v442_v48 = vld [vmem:[%s1834_s8 + $0x38] sm:$0xff]  ;;  %v624_v0 = vld [vmem:[%s1837_s10 + $0x48] sm:$0xff] }
  0x2b   :  { %1077 = vmatpush3.msra.mxu0 %v233_v49  ;;  %v441_v49 = vld [vmem:[%s1834_s8 + $0x30] sm:$0xff] }
  0x2c   :  { %1078 = vmatprep.subr.mxu0 %v248_v50  ;;  %v540_v50 = vld [vmem:[%s1836_s9 + $0x10] sm:$0xff] }
  0x2d   :  { %1079 = vmatpush3.msra.mxu0 %v232_v51  ;;  %v440_v51 = vld [vmem:[%s1834_s8 + $0x28] sm:$0xff] }
  0x2e   :  { %1179 = vmatprep.subr.mxu0 %v1274_v3 }
  0xce   :  { %v154_v10 = vpop.f32.mrf.mxu0 }
  0xcf   :  { %v155_v12 = vadd.f32 %v154_v10, %v72_v8  ;;  %v617_v8 = vld [vmem:[%s1837_s10 + $0x10] sm:$0xff] }
  0xd0   :  { %v156_v13 = vpop.f32.mrf.mxu0  ;;  %v225_v15 = vpop.f32.mrf.mxu1 }
  0xd1   :  { %v157_v14 = vadd.f32 %v156_v13, %v76_v9  ;;  %v226_v16 = vadd.f32 %v225_v15, %v80_v11  ;;  %v229_v20 = vmax.f32 %v155_v12, 0.0  ;;  %v1033_v11 = vld [vmem:[%s1838_s5] ss:$0 sm:$0xff] }
  0xd2   :  { %v1151_v19 = vpop.f32.mrf.mxu1 }
  0xd3   :  { %v230_v18 = vmax.f32 %v157_v14, 0.0  ;;  %v231_v21 = vmax.f32 %v226_v16, 0.0 }
  0xd5   :  { %335 = vmatprep.mubr.f32.mxu0 %v230_v18  ;;  %1177 = vmatmul.mubr.msk.f32.vlgmr.msra.gmra.mxu1 %vm360_vm2, %v231_v21  ;;  %v616_v18 = vld [vmem:[%s1837_s10 + $0x8] sm:$0xff]  ;;  %v705_v21 = vld [vmem:[%s1839_s11 + $0x18] sm:$0xff] }
  0xd6   :  { %336 = vmatmul.mubr.f32.vlgmr.msra.gmra.mxu0 %v229_v20  ;;  %468 = vmatpush1.msra.mxu1 %v465_v22  ;;  %v615_v20 = vld [vmem:[%s1837_s10] sm:$0xff]  ;;  %v704_v22 = vld [vmem:[%s1839_s11 + $0x10] sm:$0xff] }
  0xd7   :  { %1180 = vmatpush3.msra.mxu0 %v543_v23  ;;  %469 = vmatprep.subr.mxu1 %v464_v24 }
  0xd8   :  { %1181 = vmatprep.subr.mxu0 %v1274_v3  ;;  %470 = vmatpush1.msra.mxu1 %v463_v25  ;;  %v703_v25 = vld [vmem:[%s1839_s11 + $0x8] sm:$0xff] }
  0xd9   :  { %1182 = vmatpush3.msra.mxu0 %v542_v26  ;;  %471 = vmatprep.subr.mxu1 %v462_v27  ;;  %v702_v26 = vld [vmem:[%s1839_s11] sm:$0xff] }
  0xda   :  { %1183 = vmatprep.subr.mxu0 %v1274_v3  ;;  %472 = vmatpush1.msra.mxu1 %v461_v28 }
  0xdb   :  { %1184 = vmatpush3.msra.mxu0 %v541_v29  ;;  %473 = vmatprep.subr.mxu1 %v460_v30 }
  0xdc   :  { %1185 = vmatprep.subr.mxu0 %v1274_v3  ;;  %474 = vmatpush1.msra.mxu1 %v459_v31 }
  0xdd   :  { %1191 = vmatprep.mubr.msk.f32.mxu0 %vm1275_vm0, %v1274_v3  ;;  %475 = vmatprep.subr.mxu1 %v458_v32 }
  0xde   :  { %531 = vmatprep.mubr.f32.mxu1 %v1274_v3  ;;  %476 = vmatpush1.msra.mxu1 %v457_v33 }
  0xdf   :  { %477 = vmatprep.subr.mxu1 %v456_v34  ;;  %1186 = vmatpush3.msra.mxu0 %v540_v50 }
  0xe0   :  { %478 = vmatpush1.msra.mxu1 %v455_v35  ;;  %1187 = vmatprep.subr.mxu0 %v1274_v3 }
  0xe1   :  { %479 = vmatprep.subr.mxu1 %v454_v36  ;;  %1188 = vmatpush3.msra.mxu0 %v539_v53  ;;  %v862_v36 = vld [vmem:[%s1840_s12] sm:$0xff] }
  0xe2   :  { %480 = vmatpush1.msra.mxu1 %v453_v37  ;;  %1189 = vmatprep.subr.mxu0 %v1274_v3 }
  0xe3   :  { %481 = vmatprep.subr.mxu1 %v452_v38  ;;  %1190 = vmatpush3.msra.mxu0 %v538_v56  ;;  %v48_v38 = vld [vmem:[%s1841_s1] sm:$0xff] }
  0xe4   :  { %482 = vmatpush1.msra.mxu1 %v451_v39  ;;  %1192 = vmatmul.mubr.msk.f32.vlgmr.msra.gmra.mxu0 %vm84_vm1, %v1409_v17  ;;  %v629_v17 = vld [vmem:[%s1837_s10 + $0x70] sm:$0xff]  ;;  %v941_v39 = vld [vmem:[%s1842_s13 + $0x18] sm:$0xff] }
  0xe5   :  { %483 = vmatprep.subr.mxu1 %v450_v40  ;;  %1194 = vmatprep.subr.mxu0 %v1274_v3  ;;  %v940_v40 = vld [vmem:[%s1842_s13 + $0x10] sm:$0xff] }
  0xe6   :  { %484 = vmatpush1.msra.mxu1 %v449_v41  ;;  %1226 = vmatprep.mubr.msk.f32.mxu0 %vm1275_vm0, %v1274_v3  ;;  %v939_v41 = vld [vmem:[%s1842_s13 + $0x8] sm:$0xff] }
  0xe7   :  { %485 = vmatprep.subr.mxu1 %v448_v42  ;;  %1195 = vmatpush3.msra.mxu0 %v630_v59  ;;  %v938_v42 = vld [vmem:[%s1842_s13] sm:$0xff]  ;;  %s1276_s13 = smov 124  }
  0xe8   :  { %486 = vmatpush1.msra.mxu1 %v447_v43  ;;  %1196 = vmatprep.subr.mxu0 %v1274_v3 }
  0xe9   :  { %487 = vmatprep.subr.mxu1 %v446_v44  ;;  %1197 = vmatpush3.msra.mxu0 %v629_v17 }
  0xea   :  { %488 = vmatpush1.msra.mxu1 %v445_v45  ;;  %1198 = vmatprep.subr.mxu0 %v1274_v3 }
  0xeb   :  { %489 = vmatprep.subr.mxu1 %v444_v46  ;;  %1199 = vmatpush3.msra.mxu0 %v628_v60 }
  0xec   :  { %490 = vmatpush1.msra.mxu1 %v443_v47  ;;  %1200 = vmatprep.subr.mxu0 %v1274_v3 }
  0xed   :  { %491 = vmatprep.subr.mxu1 %v442_v48  ;;  %1201 = vmatpush3.msra.mxu0 %v627_v61 }
  0xee   :  { %492 = vmatpush1.msra.mxu1 %v441_v49  ;;  %1202 = vmatprep.subr.mxu0 %v1274_v3 }
  0xef   :  { %493 = vmatprep.subr.mxu1 %v440_v51  ;;  %1203 = vmatpush3.msra.mxu0 %v626_v62 }
  0xf0   :  { %494 = vmatpush1.msra.mxu1 %v439_v52  ;;  %1204 = vmatprep.subr.mxu0 %v1274_v3 }
  0xf1   :  { %495 = vmatprep.subr.mxu1 %v438_v54  ;;  %1205 = vmatpush3.msra.mxu0 %v625_v63 }
  0xf2   :  { %496 = vmatpush1.msra.mxu1 %v437_v55  ;;  %1206 = vmatprep.subr.mxu0 %v1274_v3 }
  0xf3   :  { %497 = vmatprep.subr.mxu1 %v436_v57  ;;  %1207 = vmatpush3.msra.mxu0 %v624_v0 }
  0xf4   :  { %498 = vmatpush1.msra.mxu1 %v435_v58  ;;  %1208 = vmatprep.subr.mxu0 %v1274_v3 }
  0xf5   :  { %1229 = vmatprep.subr.mxu1 %v1274_v3  ;;  %1209 = vmatpush3.msra.mxu0 %v623_v1 }
  0xf6   :  { %1210 = vmatprep.subr.mxu0 %v1274_v3 }
  0xf7   :  { %1211 = vmatpush3.msra.mxu0 %v622_v2 }
  0xf8   :  { %1212 = vmatprep.subr.mxu0 %v1274_v3 }
  0xf9   :  { %1213 = vmatpush3.msra.mxu0 %v621_v4 }
  0xfa   :  { %1214 = vmatprep.subr.mxu0 %v1274_v3 }
  0xfb   :  { %1215 = vmatpush3.msra.mxu0 %v620_v5 }
  0xfc   :  { %1216 = vmatprep.subr.mxu0 %v1274_v3 }
  0xfd   :  { %1217 = vmatpush3.msra.mxu0 %v619_v6 }
  0xfe   :  { %1218 = vmatprep.subr.mxu0 %v1274_v3 }
  0xff   :  { %1219 = vmatpush3.msra.mxu0 %v618_v7 }
 0x100   :  { %1220 = vmatprep.subr.mxu0 %v1274_v3 }
 0x101   :  { %1221 = vmatpush3.msra.mxu0 %v617_v8 }
 0x102   :  { %1222 = vmatprep.subr.mxu0 %v1274_v3 }
 0x103   :  { %1223 = vmatpush3.msra.mxu0 %v616_v18 }
 0x104   :  { %1224 = vmatprep.subr.mxu0 %v1274_v3 }
 0x105   :  { %1225 = vmatpush3.msra.mxu0 %v615_v20 }
 0x106   :  { %1256 = vmatprep.subr.mxu0 %v1274_v3 }
 0x195   :  { %v1758_v10 = vpop.f32.mrf.mxu1 }
 0x196   :  { %v1080_v9 = vpop.f32.mrf.mxu0 }
 0x197   :  { %v1178_v13 = vpop.f32.mrf.mxu1 }
 0x198   :  { %v1081_v12 = vpop.f32.mrf.mxu0 }
 0x199   :  { %v1082_v14 = vadd.f32 %v1081_v12, %v1080_v9 }
 0x19b   :  { %v338_v15 = vadd.f32 %v1082_v14, %v1033_v11 }
 0x19d   :  { %532 = vmatmul.mubr.f32.vlgmr.msra.gmra.mxu1 %v338_v15 }
 0x19e   :  { %1237 = vmatprep.mubr.msk.f32.mxu1 %vm1275_vm0, %v1274_v3  ;;  %1230 = vmatpush3.msra.mxu1 %v705_v21 }
 0x19f   :  { %1231 = vmatprep.subr.mxu1 %v1274_v3 }
 0x1a0   :  { %1232 = vmatpush3.msra.mxu1 %v704_v22 }
 0x1a1   :  { %1233 = vmatprep.subr.mxu1 %v1274_v3 }
 0x1a2   :  { %1234 = vmatpush3.msra.mxu1 %v703_v25 }
 0x1a3   :  { %1235 = vmatprep.subr.mxu1 %v1274_v3 }
 0x1a4   :  { %v610_v16 = vpop.f32.mrf.mxu0  ;;  %1236 = vmatpush3.msra.mxu1 %v702_v26 }
 0x1a5   :  { %1240 = vmatprep.subr.mxu1 %v1274_v3 }
 0x1a6   :  { %v1193_v19 = vpop.f32.mrf.mxu0 }
 0x25d   :  { %v533_v23 = vpop.f32.mrf.mxu1 }
 0x25e   :  { %v614_v24 = vmul.f32 %v610_v16, %v533_v23 }
 0x25f   :  { %v535_v27 = vpop.f32.mrf.mxu1 }
 0x260   :  { %1227 = vmatmul.mubr.f32.vlgmr.msra.gmra.mxu0 %v614_v24 }
 0x261   :  { %1264 = vmatprep.mubr.msk.f32.mxu0 %vm1275_vm0, %v1274_v3  ;;  %1257 = vmatpush3.msra.mxu0 %v941_v39 }
 0x262   :  { %1258 = vmatprep.subr.mxu0 %v1274_v3 }
 0x263   :  { %1259 = vmatpush3.msra.mxu0 %v940_v40 }
 0x264   :  { %1260 = vmatprep.subr.mxu0 %v1274_v3 }
 0x265   :  { %1261 = vmatpush3.msra.mxu0 %v939_v41 }
 0x266   :  { %1262 = vmatprep.subr.mxu0 %v1274_v3 }
 0x267   :  { %1263 = vmatpush3.msra.mxu0 %v938_v42 }
 0x320   :  { %v697_v28 = vpop.f32.mrf.mxu0 }
 0x321   :  { %v701_v29 = vadd.f32 %v697_v28, %v535_v27 }
 0x322   :  { %v1228_v30 = vpop.f32.mrf.mxu0 }
 0x323   :  { %1238 = vmatmul.mubr.msk.f32.vlgmr.msra.gmra.mxu1 %vm706_vm3, %v701_v29 }
 0x324   :  { %1241 = vmatpush3.msra.mxu1 %v705_v21  ;;  %1248 = vmatprep.mubr.msk.f32.mxu1 %vm1275_vm0, %v1274_v3 }
 0x325   :  { %1242 = vmatprep.subr.mxu1 %v1274_v3 }
 0x326   :  { %1243 = vmatpush3.msra.mxu1 %v704_v22 }
 0x327   :  { %1244 = vmatprep.subr.mxu1 %v1274_v3 }
 0x328   :  { %1245 = vmatpush3.msra.mxu1 %v703_v25 }
 0x329   :  { %1246 = vmatprep.subr.mxu1 %v1274_v3 }
 0x32a   :  { %1247 = vmatpush3.msra.mxu1 %v702_v26 }
 0x32b   :  { %1251 = vmatprep.subr.mxu1 %v1274_v3 }
 0x3e3   :  { %v776_v31 = vpop.f32.mrf.mxu1 }
 0x3e4   :  { %v780_v32 = vmul.f32 0.125, %v776_v31 }
 0x3e5   :  { %v1239_v33 = vpop.f32.mrf.mxu1 }
 0x3e6   :  { %v781_v34 = vsub.f32 %v701_v29, %v780_v32 }
 0x3e8   :  { %v782_v35 = vmul.f32 1.442695, %v781_v34 }
 0x3ea   :  { %1270 = vpow2.f32 %v782_v35 }
 0x3f7   :  { %v1271_v37 = vpop.eup %1270 }
 0x3f8   :  { %1249 = vmatmul.mubr.msk.f32.vlgmr.msra.gmra.mxu1 %vm706_vm3, %v1271_v37 }
 0x3f9   :  { %1252 = vmatpush3.msra.mxu1 %v862_v36  ;;  %1253 = vmatprep.mubr.msk.f32.mxu1 %vm1275_vm0, %v1274_v3  ;;  %v1034_v3 = vld [vmem:[%s1843_s7] ss:$0 sm:$0xff] }
 0x3fa   :  { %v431_v53 = vadd.f32 %v1034_v3, %v1758_v10 }
 0x3fc   :  { %1254 = vmatmul.mubr.msk.f32.vlgmr.msra.gmra.mxu1 %vm863_vm4, %v48_v38  ;;  %v434_v54 = vand.u32 2147483647, %v431_v53 }
 0x4b8   :  { %v853_v43 = vpop.f32.mrf.mxu1 }
 0x4b9   :  { %1272 = vrcp.f32 %v853_v43 }
 0x4ba   :  { %v1250_v44 = vpop.f32.mrf.mxu1 }
 0x4bc   :  { %v933_v45 = vpop.f32.mrf.mxu1 }
 0x4be   :  { %v1255_v46 = vpop.f32.mrf.mxu1 }
 0x4c6   :  { %v1273_v47 = vpop.eup %1272 }
 0x4c7   :  { %v858_v48 = vmul.f32 %v1273_v47, %v853_v43 }
 0x4c9   :  { %v859_v49 = vsub.f32 2.0, %v858_v48 }
 0x4cb   :  { %v860_v50 = vmul.f32 %v1273_v47, %v859_v49 }
 0x4cd   :  { %v861_v51 = vmul.f32 %v1271_v37, %v860_v50 }
 0x4cf   :  { %v937_v52 = vmul.f32 %v933_v45, %v861_v51 }
 0x4d1   :  { %1265 = vmatmul.mubr.msk.f32.vlgmr.msra.gmra.mxu0 %vm706_vm3, %v937_v52 }
 0x591   :  { %v1011_v55 = vpop.f32.mrf.mxu0 }
 0x592   :  { %v1015_v56 = vmul.f32 %v1011_v55, %v434_v54 }
 0x593   :  { %v1266_v57 = vpop.f32.mrf.mxu0 }
 0x594   :  { %v1017_v58 = vsel %vm1016_vm5, %v1015_v56, 0.0 }
 0x595   :  { %1018 = vadd.xlane.f32.xlu0 %v1017_v58 }
 0x61e   :  { %v1019_v59 = vpop.xlane.xlu0 %1018 }
 0x61f   :  { %v1020_v17 = vadd.f32 %v1019_v59, %v431_v53 }
 0x621   :  { %1022 = vrot.lane.b32.xlu0 %v1020_v17, %s1276_s13 }
 0x693   :  { %v1023_v60 = vpop.permute.xlu0 %1022 }
 0x694   :  { %1026 = vst.msk [vmem:[%s1844_s14] sm:$0xff] %vm1025_vm6, %v1023_v60 }

</bundles_post_ra>
